<compile_context>
chip_gen: v7x
topology: tpu7x:2x2x1
jax: 0.10.0
libtpu: 0.0.40
codegen_flags: <defaults>
</compile_context>

<pallas_src>
import functools

import jax
import jax.numpy as jnp
from jax.experimental import pallas as pl
from jax.experimental.pallas import tpu as pltpu


def class_attention_kernel(labels_ref, dh_ref, wd_ref, wcols_ref, bf_ref,
                           awe_ref, alpha_ref, *, L_actual):
    labels = labels_ref[...]                       # (bB, Lp)   lanes = Lp
    dh = dh_ref[...]                               # (bB, D)
    wcols = wcols_ref[...]                         # (A, 3) = [we | be+bd | wf]
    we_col = wcols[:, 0:1]                         # (A, 1)
    b_col = wcols[:, 1:2]                          # (A, 1)
    wf_col = wcols[:, 2:3]                         # (A, 1)

    bB, Lp = labels.shape

    # decoder_att: (bB, D) @ (D, A) on the MXU (both linear biases folded in
    # via b_col below).
    t2 = jnp.dot(dh, wd_ref[...], preferred_element_type=jnp.float32)   # (bB, A)

    # Put the attention axis A on sublanes / labels on lanes: (bB, A, 1).
    t2c = t2[:, :, None] + b_col[None, :, :]       # (bB, A, 1)

    # att1 + att2, ReLU:  h[b, a, l] = relu(we[a] * labels[b, l] + t2[b, a])
    h = labels[:, None, :] * we_col[None, :, :] + t2c      # (bB, A, Lp)
    h = jnp.maximum(h, 0.0)

    # full_att: weighted reduction over A (a sublane reduction -> VPU adds);
    # the result is already lane-dense (bB, Lp).
    att = jnp.sum(h * wf_col[None, :, :], axis=1) + bf_ref[0, 0]   # (bB, Lp)

    # Mask the padded label columns before the softmax.
    if Lp > L_actual:
        col = jax.lax.broadcasted_iota(jnp.int32, (bB, Lp), 1)
        att = jnp.where(col < L_actual, att, -1e30)

    # softmax over the label axis (PyTorch dim=1).
    m = jnp.max(att, axis=-1, keepdims=True)
    e = jnp.exp(att - m)
    s = jnp.sum(e, axis=-1, keepdims=True)
    inv = pl.reciprocal(s, approx=True)
    inv = inv * (2.0 - s * inv)                    # one Newton step -> ~f32 exact
    alpha = e * inv

    alpha_ref[...] = alpha
    awe_ref[...] = labels * alpha


def class_attention(labels, decoder_hidden, params, *, block_B=None):
    """labels: (B, L), decoder_hidden: (B, D) -> (awe, alpha), each (B, L) f32."""
    labels = labels.astype(jnp.float32)
    decoder_hidden = decoder_hidden.astype(jnp.float32)
    B, L = labels.shape
    D = decoder_hidden.shape[1]
    A = params["encoder_att.weight"].shape[0]

    # Lane-dense label axis.
    Lp = ((L + 127) // 128) * 128

    # Batch tiling: whole batch if tiny, otherwise a multiple of 8 sized so the
    # (block_B, A, Lp) f32 intermediate stays around <= 4 MiB.
    if block_B is None:
        if B <= 8:
            block_B = B
        else:
            cand = (4 * 1024 * 1024) // (A * Lp * 4)
            block_B = int(min(512, max(8, (cand // 8) * 8)))
    Bp = ((B + block_B - 1) // block_B) * block_B
    # TODO(synk): for very large L (block_B*A*Lp*4 >> VMEM) add an L-tile grid
    # axis with a VMEM-resident t2 and an online softmax.

    labels_p = labels
    if (Bp, Lp) != (B, L):
        labels_p = jnp.zeros((Bp, Lp), jnp.float32).at[:B, :L].set(labels)
    dh_p = decoder_hidden
    if Bp != B:
        dh_p = jnp.zeros((Bp, D), jnp.float32).at[:B, :].set(decoder_hidden)

    # Parameter packing: one (A, 3) VMEM array + one scalar in SMEM.
    wcols = jnp.stack(
        [params["encoder_att.weight"].reshape(A),
         params["encoder_att.bias"] + params["decoder_att.bias"],
         params["full_att.weight"].reshape(A)],
        axis=1).astype(jnp.float32)                                   # (A, 3)
    wd_t = params["decoder_att.weight"].T.astype(jnp.float32)         # (D, A)
    bf = params["full_att.bias"].reshape(1, 1).astype(jnp.float32)    # (1, 1)

    grid = (Bp // block_B,)
    kernel = functools.partial(class_attention_kernel, L_actual=L)

    out_shape = (jax.ShapeDtypeStruct((Bp, Lp), jnp.float32),
                 jax.ShapeDtypeStruct((Bp, Lp), jnp.float32))

    awe_p, alpha_p = pl.pallas_call(
        kernel,
        out_shape=out_shape,
        grid=grid,
        in_specs=[
            pl.BlockSpec((block_B, Lp), lambda i: (i, 0)),     # labels tile
            pl.BlockSpec((block_B, D), lambda i: (i, 0)),      # decoder_hidden tile
            pl.BlockSpec((D, A), lambda i: (0, 0)),            # decoder_att.weight^T (resident)
            pl.BlockSpec((A, 3), lambda i: (0, 0)),            # packed [we | be+bd | wf] (resident)
            pl.BlockSpec(memory_space=pltpu.MemorySpace.SMEM),  # full_att.bias scalar
        ],
        out_specs=(
            pl.BlockSpec((block_B, Lp), lambda i: (i, 0)),
            pl.BlockSpec((block_B, Lp), lambda i: (i, 0)),
        ),
        compiler_params=pltpu.CompilerParams(
            dimension_semantics=("parallel",),
            vmem_limit_bytes=32 * 1024 * 1024,
        ),
    )(labels_p, dh_p, wd_t, wcols, bf)

    if (Bp, Lp) != (B, L):
        return awe_p[:B, :L], alpha_p[:B, :L]
    return awe_p, alpha_p


def reference(labels, dh, params):
    """Pure-JAX reference mirroring the PyTorch module exactly."""
    we = params["encoder_att.weight"]        # (A, 1)
    be = params["encoder_att.bias"]          # (A,)
    wd = params["decoder_att.weight"]        # (A, D)
    bd = params["decoder_att.bias"]          # (A,)
    wf = params["full_att.weight"]           # (1, A)
    bf = params["full_att.bias"]             # (1,)

    att1 = labels[:, :, None] * we[:, 0][None, None, :] + be[None, None, :]
    att2 = dh @ wd.T + bd
    att = jnp.maximum(att1 + att2[:, None, :], 0.0) @ wf[0] + bf[0]
    alpha = jax.nn.softmax(att, axis=1)
    return labels * alpha, alpha


if __name__ == "__main__":
    B, L, D, A = 2, 8, 32, 128   # batch, nr_labels, decoder_dim, attention_dim

    key = jax.random.PRNGKey(0)
    ks = jax.random.split(key, 8)
    params = {
        "encoder_att.weight": 0.1 * jax.random.normal(ks[0], (A, 1), jnp.float32),
        "encoder_att.bias":   0.1 * jax.random.normal(ks[1], (A,), jnp.float32),
        "decoder_att.weight": 0.1 * jax.random.normal(ks[2], (A, D), jnp.float32),
        "decoder_att.bias":   0.1 * jax.random.normal(ks[3], (A,), jnp.float32),
        "full_att.weight":    0.1 * jax.random.normal(ks[4], (1, A), jnp.float32),
        "full_att.bias":      0.1 * jax.random.normal(ks[5], (1,), jnp.float32),
    }
    labels = jax.random.normal(ks[6], (B, L), jnp.float32)
    decoder_hidden = jax.random.normal(ks[7], (B, D), jnp.float32)

    awe, alpha = class_attention(labels, decoder_hidden, params)
    jax.block_until_ready((awe, alpha))

    awe_ref, alpha_ref = reference(labels, decoder_hidden, params)
    assert awe.shape == (B, L) and alpha.shape == (B, L)
    assert jnp.allclose(awe, awe_ref, atol=1e-5, rtol=1e-5), "awe mismatch"
    assert jnp.allclose(alpha, alpha_ref, atol=1e-5, rtol=1e-5), "alpha mismatch"

    print("KERNEL_OK")
</pallas_src>

<mosaic_0001>
module attributes {stable_mosaic.version = 11 : i64} {
  func.func @class_attention_kernel(%arg0: i32, %arg1: memref<2x128xf32, #tpu.memory_space<vmem>>, %arg2: memref<2x32xf32, #tpu.memory_space<vmem>>, %arg3: memref<32x128xf32, #tpu.memory_space<vmem>>, %arg4: memref<128x3xf32, #tpu.memory_space<vmem>>, %arg5: memref<1x1xf32, #tpu.memory_space<smem>>, %arg6: memref<2x128xf32, #tpu.memory_space<vmem>>, %arg7: memref<2x128xf32, #tpu.memory_space<vmem>>) attributes {dimension_semantics = [#tpu.dimension_semantics<parallel>], iteration_bounds = array<i64: 1>, scalar_prefetch = 0 : i64, scratch_operands = 0 : i64, tpu.core_type = #tpu.core_type<tc>, window_params = [{transform_indices = @transform_0, window_bounds = array<i64: 2, 128>}, {transform_indices = @transform_1, window_bounds = array<i64: 2, 32>}, {pipeline_mode = #tpu.pipeline_mode<synchronous>, transform_indices = @transform_2, window_bounds = array<i64: 32, 128>}, {pipeline_mode = #tpu.pipeline_mode<synchronous>, transform_indices = @transform_3, window_bounds = array<i64: 128, 3>}, {transform_indices = @transform_4, window_bounds = array<i64: 1, 1>}, {transform_indices = @transform_5, window_bounds = array<i64: 2, 128>}, {transform_indices = @transform_6, window_bounds = array<i64: 2, 128>}]} {
    %c0 = arith.constant 0 : index
    %c0_0 = arith.constant 0 : index
    %0 = vector.load %arg1[%c0, %c0_0] : memref<2x128xf32, #tpu.memory_space<vmem>>, vector<2x128xf32>
    %c0_1 = arith.constant 0 : index
    %c0_2 = arith.constant 0 : index
    %1 = vector.load %arg2[%c0_1, %c0_2] : memref<2x32xf32, #tpu.memory_space<vmem>>, vector<2x32xf32>
    %c0_3 = arith.constant 0 : index
    %c0_4 = arith.constant 0 : index
    %2 = vector.load %arg4[%c0_3, %c0_4] : memref<128x3xf32, #tpu.memory_space<vmem>>, vector<128x3xf32>
    %3 = vector.extract_strided_slice %2 {offsets = [0, 0], sizes = [128, 1], strides = [1, 1]} : vector<128x3xf32> to vector<128x1xf32>
    %4 = vector.extract_strided_slice %2 {offsets = [0, 1], sizes = [128, 1], strides = [1, 1]} : vector<128x3xf32> to vector<128x1xf32>
    %5 = vector.extract_strided_slice %2 {offsets = [0, 2], sizes = [128, 1], strides = [1, 1]} : vector<128x3xf32> to vector<128x1xf32>
    %c0_5 = arith.constant 0 : index
    %c0_6 = arith.constant 0 : index
    %6 = vector.load %arg3[%c0_5, %c0_6] : memref<32x128xf32, #tpu.memory_space<vmem>>, vector<32x128xf32>
    %cst = arith.constant dense<0.000000e+00> : vector<2x128xf32>
    %7 = tpu.matmul %1, %6, %cst {dimension_numbers = #tpu.dot_dimension_numbers<[1], [0], [0], [1], [0, 0, 1, 1], [], []>} : vector<2x32xf32>, vector<32x128xf32>, vector<2x128xf32> -> vector<2x128xf32>
    %8 = vector.shape_cast %7 : vector<2x128xf32> to vector<2x128x1xf32>
    %9 = vector.shape_cast %4 : vector<128x1xf32> to vector<1x128x1xf32>
    %10 = vector.broadcast %9 : vector<1x128x1xf32> to vector<2x128x1xf32>
    %11 = arith.addf %8, %10 : vector<2x128x1xf32>
    %12 = vector.shape_cast %0 : vector<2x128xf32> to vector<2x1x128xf32>
    %13 = vector.shape_cast %3 : vector<128x1xf32> to vector<1x128x1xf32>
    %14 = vector.broadcast %12 : vector<2x1x128xf32> to vector<2x128x128xf32>
    %15 = vector.broadcast %13 : vector<1x128x1xf32> to vector<2x128x128xf32>
    %16 = arith.mulf %14, %15 : vector<2x128x128xf32>
    %17 = vector.broadcast %11 : vector<2x128x1xf32> to vector<2x128x128xf32>
    %18 = arith.addf %16, %17 : vector<2x128x128xf32>
    %cst_7 = arith.constant 0.000000e+00 : f32
    %19 = vector.broadcast %cst_7 : f32 to vector<2x128x128xf32>
    %20 = arith.maximumf %18, %19 : vector<2x128x128xf32>
    %21 = vector.shape_cast %5 : vector<128x1xf32> to vector<1x128x1xf32>
    %22 = vector.broadcast %21 : vector<1x128x1xf32> to vector<2x128x128xf32>
    %23 = arith.mulf %20, %22 : vector<2x128x128xf32>
    %cst_8 = arith.constant dense<0.000000e+00> : vector<2x128xf32>
    %24 = vector.multi_reduction <add>, %23, %cst_8 [1] : vector<2x128x128xf32> to vector<2x128xf32>
    %c0_9 = arith.constant 0 : index
    %c0_10 = arith.constant 0 : index
    %25 = memref.load %arg5[%c0_9, %c0_10] : memref<1x1xf32, #tpu.memory_space<smem>>
    %26 = vector.broadcast %25 : f32 to vector<2x128xf32>
    %27 = arith.addf %24, %26 : vector<2x128xf32>
    %28 = tpu.iota {dimensions = array<i32: 1>} : vector<2x128xi32>
    %c8_i32 = arith.constant 8 : i32
    %29 = vector.broadcast %c8_i32 : i32 to vector<2x128xi32>
    %30 = arith.cmpi slt, %28, %29 : vector<2x128xi32>
    %cst_11 = arith.constant -1.000000e+30 : f32
    %31 = vector.broadcast %cst_11 : f32 to vector<2x128xf32>
    %32 = arith.select %30, %27, %31 : vector<2x128xi1>, vector<2x128xf32>
    %cst_12 = arith.constant dense<0xFF800000> : vector<2xf32>
    %33 = vector.multi_reduction <maximumf>, %32, %cst_12 [1] : vector<2x128xf32> to vector<2xf32>
    %34 = vector.shape_cast %33 : vector<2xf32> to vector<2x1xf32>
    %35 = vector.broadcast %34 : vector<2x1xf32> to vector<2x128xf32>
    %36 = arith.subf %32, %35 : vector<2x128xf32>
    %37 = math.exp %36 : vector<2x128xf32>
    %cst_13 = arith.constant dense<0.000000e+00> : vector<2xf32>
    %38 = vector.multi_reduction <add>, %37, %cst_13 [1] : vector<2x128xf32> to vector<2xf32>
    %39 = vector.shape_cast %38 : vector<2xf32> to vector<2x1xf32>
    %40 = tpu.reciprocal %39 {approx = true} : vector<2x1xf32> -> vector<2x1xf32>
    %41 = arith.mulf %39, %40 : vector<2x1xf32>
    %cst_14 = arith.constant 2.000000e+00 : f32
    %42 = vector.broadcast %cst_14 : f32 to vector<2x1xf32>
    %43 = arith.subf %42, %41 : vector<2x1xf32>
    %44 = arith.mulf %40, %43 : vector<2x1xf32>
    %45 = vector.broadcast %44 : vector<2x1xf32> to vector<2x128xf32>
    %46 = arith.mulf %37, %45 : vector<2x128xf32>
    %c0_15 = arith.constant 0 : index
    %c0_16 = arith.constant 0 : index
    %47 = vector.load %arg7[%c0_15, %c0_16] : memref<2x128xf32, #tpu.memory_space<vmem>>, vector<2x128xf32>
    tpu.vector_store %arg7[%c0_15, %c0_16], %46 {strides = array<i32>} : memref<2x128xf32, #tpu.memory_space<vmem>>, vector<2x128xf32>,
    %48 = arith.mulf %0, %46 : vector<2x128xf32>
    %c0_17 = arith.constant 0 : index
    %c0_18 = arith.constant 0 : index
    %49 = vector.load %arg6[%c0_17, %c0_18] : memref<2x128xf32, #tpu.memory_space<vmem>>, vector<2x128xf32>
    tpu.vector_store %arg6[%c0_17, %c0_18], %48 {strides = array<i32>} : memref<2x128xf32, #tpu.memory_space<vmem>>, vector<2x128xf32>,
    return
  }
  func.func @transform_0(%arg0: i32) -> (i32, i32) {
    %c0_i32 = arith.constant 0 : i32
    %c0_i32_0 = arith.constant 0 : i32
    return %arg0, %c0_i32 : i32, i32
  }
  func.func @transform_1(%arg0: i32) -> (i32, i32) {
    %c0_i32 = arith.constant 0 : i32
    %c0_i32_0 = arith.constant 0 : i32
    return %arg0, %c0_i32 : i32, i32
  }
  func.func @transform_2(%arg0: i32) -> (i32, i32) {
    %c0_i32 = arith.constant 0 : i32
    %c0_i32_0 = arith.constant 0 : i32
    %c0_i32_1 = arith.constant 0 : i32
    return %c0_i32, %c0_i32_0 : i32, i32
  }
  func.func @transform_3(%arg0: i32) -> (i32, i32) {
    %c0_i32 = arith.constant 0 : i32
    %c0_i32_0 = arith.constant 0 : i32
    %c0_i32_1 = arith.constant 0 : i32
    return %c0_i32, %c0_i32_0 : i32, i32
  }
  func.func @transform_4(%arg0: i32) -> (i32, i32) {
    %c0_i32 = arith.constant 0 : i32
    %c0_i32_0 = arith.constant 0 : i32
    %c0_i32_1 = arith.constant 0 : i32
    return %c0_i32, %c0_i32_0 : i32, i32
  }
  func.func @transform_5(%arg0: i32) -> (i32, i32) {
    %c0_i32 = arith.constant 0 : i32
    %c0_i32_0 = arith.constant 0 : i32
    return %arg0, %c0_i32 : i32, i32
  }
  func.func @transform_6(%arg0: i32) -> (i32, i32) {
    %c0_i32 = arith.constant 0 : i32
    %c0_i32_0 = arith.constant 0 : i32
    return %arg0, %c0_i32 : i32, i32
  }
}

</mosaic_0001>

<bundles_post_ra>
// kernel: tpu_custom_call.1
= control target key start
LH: loop header
LB: loop body
LE: loop exit
PB: predicated region body
PF: predicated region fallthrough
CT: control target
= control target key end

     0   :  { %13 = vsyncpa [#allocation4], 0  ;;  %v957_v3 = vmov 0.0|0.0   ;;  %vm958_vm0 = vmmov 0   ;;  %v959_v6 = vmov 0.0   ;;  %v960_v8 = vmov 0   ;;  %s1392_s0 = inlined_call_operand.vmem [shape: f32[2,128], index: 0, kind: input, shape index: {}]   ;;  %s1393_s1 = inlined_call_operand.vmem [shape: f32[2,32], index: 1, kind: input, shape index: {}]   ;;  %s1394_s2 = inlined_call_operand.vmem [shape: f32[32,128], index: 2, kind: input, shape index: {}]   ;;  %s1395_s3 = inlined_call_operand.vmem [shape: f32[128,3], index: 3, kind: input, shape index: {}]   ;;  %s1396_s4 = inlined_call_operand.<no memory space> [shape: f32[1,1], index: 4, kind: input, shape index: {}]   ;;  %s1397_s5 = inlined_call_operand.hbm [shape: f32[2,128], index: 5, kind: output, shape index: {0}]   ;;  %s1398_s6 = inlined_call_operand.hbm [shape: f32[2,128], index: 6, kind: output, shape index: {1}]  }
   0x1   :  { %v43_v0 = vld [vmem:[%s1394_s2] sm:$0xff]  ;;  %v44_v1 = vld [vmem:[%s1394_s2 + $0x8] sm:$0xff]  ;;  %v45_v2 = vld [vmem:[%s1394_s2 + $0x10] sm:$0xff]  ;;  %870 = vmatprep.subr.bf16.mxu0 %v957_v3  ;;  %867 = vmatprep.mubr.msk.f32.mxu0 %vm958_vm0, %v959_v6  ;;  %vm47_vm1 = vcmask 261120  }
   0x2   :  { %v871_v4 = vpack.c.bf16 %v44_v1, %v43_v0  ;;  %v46_v5 = vld [vmem:[%s1394_s2 + $0x18] sm:$0xff]  ;;  %v1016_v7 = vld [vmem:[%s1395_s3 + $0x8] sm:$0xff]  ;;  %886 = vset.pattern.permute.xlu1 %v960_v8  ;;  %885 = vset.pattern.permute.xlu0 %v960_v8  ;;  %v1024_v10 = vld [vmem:[%s1395_s3 + $0x10] sm:$0xff] }
   0x3   :  { %v874_v9 = vpack.c.bf16 %v46_v5, %v45_v2  ;;  %327 = vperm.xlu1 %886, %v1016_v7   ;;  %v1029_v11 = vld [vmem:[%s1395_s3] sm:$0xff] }
   0x4   :  { %872 = vmatpush3.bf16.msra.mxu0 %v871_v4  ;;  %322 = vperm.xlu0 %885, %v1029_v11   ;;  %v26_v12 = vld [vmem:[%s1393_s1] sm:$0x3] }
   0x5   :  { %873 = vmatprep.subr.bf16.mxu0 %v957_v3 }
   0x7   :  { %332 = vperm.xlu1 %886, %v1024_v10  }
   0x8   :  { %875 = vmatpush3.bf16.msra.mxu0 %v874_v9 }
   0x9   :  { %14 = vsyncpa [#allocation6], 0  ;;  %v1039_v13 = vld [vmem:[%s1395_s3 + $0x18] sm:$0xff]  ;;  %v1044_v14 = vld [vmem:[%s1395_s3 + $0x20] sm:$0xff]  ;;  %v1400_v16 = vmov 2   ;;  %v1399_v29 = vlaneseq  ;;  %vm803_vm2 = vcmask 1041409  }
   0xa   :  { %342 = vperm.xlu0 %885, %v1044_v14   ;;  %v1050_v15 = vld [vmem:[%s1395_s3 + $0x30] sm:$0xff]  ;;  %v1060_v17 = vld [vmem:[%s1395_s3 + $0x28] sm:$0xff]  ;;  %v1072_v18 = vld [vmem:[%s1395_s3 + $0x38] sm:$0xff]  ;;  %v962_v27 = vmov 1966171168   ;;  %vm807_vm4 = vcmask 1041408  }
   0xb   :  { %868 = vmatmul.mubr.msk.f32.vlgmr.msra.gmra.mrb[0].mxu0 %vm47_vm1, %v26_v12  ;;  %337 = vperm.xlu1 %886, %v1039_v13   ;;  %v1080_v19 = vld [vmem:[%s1395_s3 + $0x48] sm:$0xff]  ;;  %v1088_v20 = vld [vmem:[%s1395_s3 + $0x58] sm:$0xff]  ;;  %v1093_v21 = vld [vmem:[%s1395_s3 + $0x40] sm:$0xff]  ;;  %v289_v28 = vunpack.c.l.s4 %v962_v27  ;;  %v122_v32 = vshrl.u32 %v1399_v29, 7  ;;  %s965_s15 = smov [#allocation3]  }
   0xc   :  { %v1104_v22 = vld [vmem:[%s1395_s3 + $0x50] sm:$0xff]  ;;  %v1114_v23 = vld [vmem:[%s1395_s3 + $0x60] sm:$0xff]  ;;  %v1121_v24 = vld [vmem:[%s1395_s3 + $0x68] sm:$0xff]  ;;  %s831_s16 = sshll.u32 %s965_s15, 4  ;;  %s832_s16 = int_to_ptr.vmem [resolvable:$true] %s831_s16 }
   0xd   :  { %v1129_v25 = vld [vmem:[%s1395_s3 + $0x70] sm:$0xff]  ;;  %v1136_v26 = vld [vmem:[%s1395_s3 + $0x78] sm:$0xff]  ;;  %v290_v31 = vunpack.c.0.s8 %v289_v28  ;;  %v1150_v35 = vld [vmem:[%s1392_s0] sm:$0x3]  ;;  %v123_v43 = vsub.s32 0, %v122_v32 }
   0xe   :  { %352 = vperm.xlu0 %885, %v1050_v15   ;;  %1405 = vst [vmem:[#allocation9_spill] sm:$0xff] %v1150_v35 }
   0xf   :  { %887 = vset.pattern.permute.xlu1 %v1400_v16  ;;  %v293_v34 = vsub.s32 %v290_v31, %v122_v32 }
  0x10   :  { %661 = vperm.xlu1 %887, %v1016_v7  }
  0x11   :  { %v294_v36 = vrot.slane %v1150_v35, %v293_v34 }
  0x12   :  { %890 = vset.pattern.permute.xlu0 %v1400_v16 }
  0x13   :  { %657 = vperm.xlu0 %890, %v1029_v11   ;;  %v295_v38 = vcombine.high %v294_v36, %v294_v36  ;;  %v302_v40 = vrot.slane %v294_v36, %v293_v34 }
  0x14   :  { %888 = vset.pattern.permute.xlu1 %v960_v8 }
  0x15   :  { %347 = vperm.xlu1 %888, %v1060_v17   ;;  %v309_v41 = vrot.slane %v295_v38, %v293_v34  ;;  %v1159_v44 = vrot.slane %v302_v40, %v123_v43 }
  0x17   :  { %669 = vperm.xlu0 %890, %v1039_v13   ;;  %v1161_v45 = vrot.slane %v309_v41, %v123_v43 }
  0x19   :  { %889 = vset.pattern.permute.xlu1 %v1400_v16 }
  0x1a   :  { %665 = vperm.xlu1 %889, %v1024_v10  }
  0x1b   :  { %677 = vperm.xlu0 %890, %v1060_v17  }
  0x1e   :  { %891 = vset.pattern.permute.xlu1 %v960_v8 }
  0x1f   :  { %685 = vperm.xlu0 %890, %v1072_v18   ;;  %357 = vperm.xlu1 %891, %v1072_v18  }
  0x23   :  { %693 = vperm.xlu0 %890, %v1080_v19   ;;  %892 = vset.pattern.permute.xlu1 %v1400_v16 }
  0x24   :  { %673 = vperm.xlu1 %892, %v1044_v14  }
  0x27   :  { %701 = vperm.xlu0 %890, %v1088_v20  }
  0x28   :  { %893 = vset.pattern.permute.xlu1 %v960_v8 }
  0x29   :  { %362 = vperm.xlu1 %893, %v1093_v21  }
  0x2d   :  { %367 = vperm.xlu1 %893, %v1080_v19  }
  0x31   :  { %894 = vset.pattern.permute.xlu1 %v1400_v16 }
  0x32   :  { %681 = vperm.xlu1 %894, %v1050_v15  }
  0x36   :  { %895 = vset.pattern.permute.xlu1 %v960_v8 }
  0x37   :  { %372 = vperm.xlu1 %895, %v1104_v22  }
  0x3b   :  { %377 = vperm.xlu1 %895, %v1088_v20  }
  0x3f   :  { %896 = vset.pattern.permute.xlu1 %v1400_v16 }
  0x40   :  { %689 = vperm.xlu1 %896, %v1093_v21  }
  0x44   :  { %897 = vset.pattern.permute.xlu1 %v960_v8 }
  0x45   :  { %382 = vperm.xlu1 %897, %v1114_v23  }
  0x49   :  { %387 = vperm.xlu1 %897, %v1121_v24  }
  0x4d   :  { %898 = vset.pattern.permute.xlu1 %v1400_v16 }
  0x4e   :  { %697 = vperm.xlu1 %898, %v1104_v22  }
  0x52   :  { %899 = vset.pattern.permute.xlu1 %v960_v8 }
  0x53   :  { %392 = vperm.xlu1 %899, %v1129_v25  }
  0x57   :  { %397 = vperm.xlu1 %899, %v1136_v26  }
  0x5b   :  { %900 = vset.pattern.permute.xlu1 %v1400_v16 }
  0x5c   :  { %705 = vperm.xlu1 %900, %v1114_v23  }
  0x60   :  { %709 = vperm.xlu1 %900, %v1121_v24  }
  0x82   :  { %v1142_v30 = vpop.permute.xlu1 %327 }
  0x83   :  { %v323_v46 = vpop.permute.xlu0 %322 }
  0x84   :  { %v1166_v48 = vmul.f32 %v323_v46, %v1159_v44  ;;  %v1169_v49 = vmul.f32 %v323_v46, %v1161_v45  ;;  %v963_v46 = vmov 1  }
  0x85   :  { %901 = vset.pattern.permute.xlu0 %v963_v46  ;;  %902 = vset.pattern.permute.xlu1 %v963_v46 }
  0x86   :  { %v1145_v33 = vpop.permute.xlu1 %332 }
  0x89   :  { %v343_v50 = vpop.permute.xlu0 %342 }
  0x8a   :  { %v1153_v37 = vpop.permute.xlu1 %337  ;;  %v1172_v51 = vmul.f32 %v343_v50, %v1159_v44  ;;  %v1175_v52 = vmul.f32 %v343_v50, %v1161_v45 }
  0x8d   :  { %v353_v54 = vpop.permute.xlu0 %352 }
  0x8e   :  { %v1180_v55 = vmul.f32 %v353_v54, %v1159_v44  ;;  %v1183_v56 = vmul.f32 %v353_v54, %v1161_v45 }
  0x8f   :  { %v1155_v39 = vpop.permute.xlu1 %661 }
  0x94   :  { %v1157_v42 = vpop.permute.xlu1 %347 }
  0x99   :  { %v1163_v47 = vpop.permute.xlu1 %665 }
  0x9e   :  { %v1177_v53 = vpop.permute.xlu1 %357 }
  0xa3   :  { %v1185_v57 = vpop.permute.xlu1 %673 }
  0xa8   :  { %v363_v58 = vpop.permute.xlu1 %362 }
  0xa9   :  { %v1188_v59 = vmul.f32 %v363_v58, %v1159_v44  ;;  %v1191_v60 = vmul.f32 %v363_v58, %v1161_v45 }
  0xac   :  { %v368_v61 = vpop.permute.xlu1 %367 }
  0xad   :  { %v1194_v62 = vmul.f32 %v368_v61, %v1159_v44  ;;  %v1197_v63 = vmul.f32 %v368_v61, %v1161_v45  ;;  %v190_v61 = vsub.s32 1, %v122_v32  ;;  %v1241_v32 = vpop.permute.xlu0 %657 }
  0xb1   :  { %v1199_v0 = vpop.permute.xlu1 %681 }
  0xb6   :  { %v373_v1 = vpop.permute.xlu1 %372 }
  0xb7   :  { %v1202_v2 = vmul.f32 %v373_v1, %v1159_v44  ;;  %v1205_v3 = vmul.f32 %v373_v1, %v1161_v45 }
  0xba   :  { %v378_v4 = vpop.permute.xlu1 %377 }
  0xbb   :  { %v1208_v5 = vmul.f32 %v378_v4, %v1159_v44  ;;  %v1211_v6 = vmul.f32 %v378_v4, %v1161_v45 }
  0xbf   :  { %v1213_v8 = vpop.permute.xlu1 %689 }
  0xc4   :  { %v383_v9 = vpop.permute.xlu1 %382 }
  0xc5   :  { %v1216_v12 = vmul.f32 %v383_v9, %v1159_v44  ;;  %v1219_v27 = vmul.f32 %v383_v9, %v1161_v45 }
  0xc7   :  { %1406 = vst [vmem:[#allocation10_spill] sm:$0xff] %v1216_v12 }
  0xc8   :  { %v388_v28 = vpop.permute.xlu1 %387 }
  0xc9   :  { %v1222_v31 = vmul.f32 %v388_v28, %v1159_v44  ;;  %v1225_v34 = vmul.f32 %v388_v28, %v1161_v45 }
  0xcb   :  { %1407 = vst [vmem:[#allocation11_spill] sm:$0xff] %v1222_v31  ;;  %1408 = vst [vmem:[#allocation12_spill] sm:$0xff] %v1225_v34 }
  0xcd   :  { %v1227_v36 = vpop.permute.xlu1 %697 }
  0xd2   :  { %v393_v38 = vpop.permute.xlu1 %392 }
  0xd3   :  { %v1230_v40 = vmul.f32 %v393_v38, %v1159_v44  ;;  %v1233_v41 = vmul.f32 %v393_v38, %v1161_v45 }
  0xd5   :  { %1409 = vst [vmem:[#allocation13_spill] sm:$0xff] %v1230_v40  ;;  %1410 = vst [vmem:[#allocation14_spill] sm:$0xff] %v1233_v41 }
  0xd6   :  { %v398_v50 = vpop.permute.xlu1 %397 }
  0xd7   :  { %v1236_v54 = vmul.f32 %v398_v50, %v1159_v44  ;;  %v1239_v58 = vmul.f32 %v398_v50, %v1161_v45 }
  0xd9   :  { %1411 = vst [vmem:[#allocation15_spill] sm:$0xff] %v1236_v54  ;;  %1412 = vst [vmem:[#allocation16_spill] sm:$0xff] %v1239_v58 }
  0xdb   :  { %v1249_v50 = vpop.permute.xlu1 %705 }
  0xdc   :  { %1413 = vst [vmem:[#allocation17_spill] sm:$0xff] %v1249_v50 }
  0xde   :  { %v117_v1 = vpop.f32.mrb[0].mxu0 }
  0xdf   :  { %v124_v4 = vrot.slane %v117_v1, %v123_v43  ;;  %v191_v9 = vrot.slane %v117_v1, %v190_v61  ;;  %v869_v28 = vpop.f32.mrb[1].mxu0  ;;  %v1243_v43 = vpop.permute.xlu0 %669 }
  0xe0   :  { %v1253_v1 = vpop.permute.xlu1 %709 }
  0xe1   :  { %193 = vbcast.lane.b32.xlu1 %v191_v9, 256  ;;  %126 = vbcast.lane.b32.xlu0 %v124_v4, 256  ;;  %1414 = vst [vmem:[#allocation18_spill] sm:$0xff] %v1253_v1 }
  0xe3   :  { %v1245_v38 = vpop.permute.xlu0 %677 }
  0xe5   :  { %197 = vbcast.lane.b32.xlu1 %v191_v9, 264  ;;  %130 = vbcast.lane.b32.xlu0 %v124_v4, 264 }
  0xe7   :  { %v1247_v46 = vpop.permute.xlu0 %685 }
  0xe9   :  { %201 = vbcast.lane.b32.xlu1 %v191_v9, 272  ;;  %134 = vbcast.lane.b32.xlu0 %v124_v4, 272 }
  0xeb   :  { %v1251_v61 = vpop.permute.xlu0 %693 }
  0xed   :  { %205 = vbcast.lane.b32.xlu1 %v191_v9, 280  ;;  %138 = vbcast.lane.b32.xlu0 %v124_v4, 280 }
  0xef   :  { %v1255_v28 = vpop.permute.xlu0 %701 }
  0xf1   :  { %209 = vbcast.lane.b32.xlu1 %v191_v9, 288  ;;  %142 = vbcast.lane.b32.xlu0 %v124_v4, 288 }
  0xf5   :  { %213 = vbcast.lane.b32.xlu1 %v191_v9, 296  ;;  %146 = vbcast.lane.b32.xlu0 %v124_v4, 296 }
  0xf9   :  { %217 = vbcast.lane.b32.xlu1 %v191_v9, 304  ;;  %150 = vbcast.lane.b32.xlu0 %v124_v4, 304 }
  0xfd   :  { %221 = vbcast.lane.b32.xlu1 %v191_v9, 312  ;;  %154 = vbcast.lane.b32.xlu0 %v124_v4, 312 }
 0x101   :  { %225 = vbcast.lane.b32.xlu1 %v191_v9, 320  ;;  %158 = vbcast.lane.b32.xlu0 %v124_v4, 320 }
 0x105   :  { %229 = vbcast.lane.b32.xlu1 %v191_v9, 328  ;;  %162 = vbcast.lane.b32.xlu0 %v124_v4, 328 }
 0x109   :  { %233 = vbcast.lane.b32.xlu1 %v191_v9, 336  ;;  %166 = vbcast.lane.b32.xlu0 %v124_v4, 336 }
 0x10d   :  { %237 = vbcast.lane.b32.xlu1 %v191_v9, 344  ;;  %170 = vbcast.lane.b32.xlu0 %v124_v4, 344 }
 0x111   :  { %241 = vbcast.lane.b32.xlu1 %v191_v9, 352  ;;  %174 = vbcast.lane.b32.xlu0 %v124_v4, 352 }
 0x115   :  { %245 = vbcast.lane.b32.xlu1 %v191_v9, 360  ;;  %178 = vbcast.lane.b32.xlu0 %v124_v4, 360 }
 0x119   :  { %249 = vbcast.lane.b32.xlu1 %v191_v9, 368  ;;  %182 = vbcast.lane.b32.xlu0 %v124_v4, 368 }
 0x11d   :  { %253 = vbcast.lane.b32.xlu1 %v191_v9, 376  ;;  %186 = vbcast.lane.b32.xlu0 %v124_v4, 376 }
 0x153   :  { %v194_v29 = vpop.permute.xlu1 %193  ;;  %v127_v16 = vpop.permute.xlu0 %126 }
 0x154   :  { %v255_v4 = vadd.f32 %v127_v16, %v1029_v11  ;;  %v271_v41 = vadd.f32 %v194_v29, %v1029_v11 }
 0x156   :  { %434 = vperm.xlu0 %901, %v255_v4  }
 0x157   :  { %v198_v9 = vpop.permute.xlu1 %197  ;;  %v131_v35 = vpop.permute.xlu0 %130 }
 0x158   :  { %v272_v54 = vadd.f32 %v198_v9, %v1016_v7  ;;  %v256_v58 = vadd.f32 %v131_v35, %v1016_v7 }
 0x15a   :  { %519 = vperm.xlu0 %901, %v272_v54   ;;  %439 = vperm.xlu1 %902, %v256_v58  }
 0x15b   :  { %v202_v40 = vpop.permute.xlu1 %201  ;;  %v135_v34 = vpop.permute.xlu0 %134 }
 0x15c   :  { %v257_v1 = vadd.f32 %v135_v34, %v1024_v10  ;;  %v273_v16 = vadd.f32 %v202_v40, %v1024_v10 }
 0x15e   :  { %514 = vperm.xlu1 %902, %v271_v41   ;;  %444 = vperm.xlu0 %901, %v257_v1  }
 0x15f   :  { %v206_v50 = vpop.permute.xlu1 %205  ;;  %v139_v12 = vpop.permute.xlu0 %138 }
 0x160   :  { %v258_v9 = vadd.f32 %v139_v12, %v1039_v13  ;;  %v274_v11 = vadd.f32 %v206_v50, %v1039_v13 }
 0x162   :  { %524 = vperm.xlu1 %902, %v273_v16  }
 0x163   :  { %v210_v4 = vpop.permute.xlu1 %209  ;;  %v143_v31 = vpop.permute.xlu0 %142 }
 0x164   :  { %v259_v7 = vadd.f32 %v143_v31, %v1044_v14  ;;  %v275_v41 = vadd.f32 %v210_v4, %v1044_v14 }
 0x166   :  { %449 = vperm.xlu1 %902, %v258_v9   ;;  %454 = vperm.xlu0 %901, %v259_v7  }
 0x167   :  { %v214_v35 = vpop.permute.xlu1 %213  ;;  %v147_v54 = vpop.permute.xlu0 %146 }
 0x168   :  { %v260_v12 = vadd.f32 %v147_v54, %v1060_v17  ;;  %v276_v13 = vadd.f32 %v214_v35, %v1060_v17 }
 0x16a   :  { %529 = vperm.xlu1 %902, %v274_v11  }
 0x16b   :  { %v218_v29 = vpop.permute.xlu1 %217  ;;  %v151_v34 = vpop.permute.xlu0 %150 }
 0x16c   :  { %v277_v10 = vadd.f32 %v218_v29, %v1050_v15  ;;  %v261_v9 = vadd.f32 %v151_v34, %v1050_v15 }
 0x16e   :  { %534 = vperm.xlu1 %902, %v275_v41   ;;  %544 = vperm.xlu0 %901, %v277_v10  }
 0x16f   :  { %v222_v40 = vpop.permute.xlu1 %221  ;;  %v155_v58 = vpop.permute.xlu0 %154 }
 0x170   :  { %v262_v31 = vadd.f32 %v155_v58, %v1072_v18  ;;  %v278_v29 = vadd.f32 %v222_v40, %v1072_v18 }
 0x172   :  { %459 = vperm.xlu1 %902, %v260_v12   ;;  %469 = vperm.xlu0 %901, %v262_v31  }
 0x173   :  { %v226_v1 = vpop.permute.xlu1 %225  ;;  %v159_v16 = vpop.permute.xlu0 %158 }
 0x174   :  { %v279_v50 = vadd.f32 %v226_v1, %v1093_v21  ;;  %v263_v10 = vadd.f32 %v159_v16, %v1093_v21 }
 0x176   :  { %539 = vperm.xlu1 %902, %v276_v13   ;;  %554 = vperm.xlu0 %901, %v279_v50  }
 0x177   :  { %v230_v14 = vpop.permute.xlu1 %229  ;;  %v163_v4 = vpop.permute.xlu0 %162 }
 0x178   :  { %v264_v7 = vadd.f32 %v163_v4, %v1080_v19  ;;  %v280_v12 = vadd.f32 %v230_v14, %v1080_v19 }
 0x17a   :  { %464 = vperm.xlu1 %902, %v261_v9   ;;  %479 = vperm.xlu0 %901, %v264_v7   ;;  %v1415_v7 = vmov 2  }
 0x17b   :  { %v234_v54 = vpop.permute.xlu1 %233  ;;  %v167_v11 = vpop.permute.xlu0 %166 }
 0x17c   :  { %v281_v41 = vadd.f32 %v234_v54, %v1104_v22  ;;  %v265_v1 = vadd.f32 %v167_v11, %v1104_v22 }
 0x17e   :  { %549 = vperm.xlu1 %902, %v278_v29   ;;  %564 = vperm.xlu0 %901, %v281_v41   ;;  %v417_v41 = vmul.f32 %v1142_v30, %v1161_v45 }
 0x17f   :  { %v238_v17 = vpop.permute.xlu1 %237  ;;  %v171_v35 = vpop.permute.xlu0 %170 }
 0x180   :  { %v266_v58 = vadd.f32 %v171_v35, %v1088_v20  ;;  %v282_v16 = vadd.f32 %v238_v17, %v1088_v20 }
 0x182   :  { %474 = vperm.xlu1 %902, %v263_v10   ;;  %489 = vperm.xlu0 %901, %v266_v58  }
 0x183   :  { %v242_v15 = vpop.permute.xlu1 %241  ;;  %v175_v34 = vpop.permute.xlu0 %174 }
 0x184   :  { %v283_v31 = vadd.f32 %v242_v15, %v1114_v23  ;;  %v267_v14 = vadd.f32 %v175_v34, %v1114_v23  ;;  %v402_v34 = vmul.f32 %v1145_v33, %v1159_v44 }
 0x186   :  { %559 = vperm.xlu1 %902, %v280_v12   ;;  %574 = vperm.xlu0 %901, %v283_v31  }
 0x187   :  { %v246_v18 = vpop.permute.xlu1 %245  ;;  %v179_v40 = vpop.permute.xlu0 %178 }
 0x188   :  { %v268_v13 = vadd.f32 %v179_v40, %v1121_v24  ;;  %v284_v22 = vadd.f32 %v246_v18, %v1121_v24  ;;  %v401_v24 = vmul.f32 %v1142_v30, %v1159_v44 }
 0x18a   :  { %484 = vperm.xlu1 %902, %v265_v1   ;;  %499 = vperm.xlu0 %901, %v268_v13  }
 0x18b   :  { %v250_v21 = vpop.permute.xlu1 %249  ;;  %v183_v9 = vpop.permute.xlu0 %182 }
 0x18c   :  { %v285_v50 = vadd.f32 %v250_v21, %v1129_v25  ;;  %v269_v20 = vadd.f32 %v183_v9, %v1129_v25 }
 0x18e   :  { %569 = vperm.xlu1 %902, %v282_v16   ;;  %584 = vperm.xlu0 %901, %v285_v50   ;;  %v418_v16 = vmul.f32 %v1145_v33, %v1161_v45 }
 0x18f   :  { %v254_v19 = vpop.permute.xlu1 %253  ;;  %v187_v54 = vpop.permute.xlu0 %186 }
 0x190   :  { %v286_v4 = vadd.f32 %v254_v19, %v1136_v26  ;;  %v270_v11 = vadd.f32 %v187_v54, %v1136_v26 }
 0x192   :  { %494 = vperm.xlu1 %902, %v267_v14   ;;  %589 = vperm.xlu0 %901, %v286_v4  }
 0x196   :  { %579 = vperm.xlu1 %902, %v284_v22   ;;  %903 = vset.pattern.permute.xlu0 %v1415_v7 }
 0x197   :  { %713 = vperm.xlu0 %903, %v1129_v25  }
 0x19a   :  { %504 = vperm.xlu1 %902, %v269_v20  }
 0x19e   :  { %509 = vperm.xlu1 %902, %v270_v11  }
 0x1a2   :  { %904 = vset.pattern.permute.xlu1 %v1415_v7 }
 0x1a3   :  { %717 = vperm.xlu1 %904, %v1136_v26  }
 0x1d5   :  { %v435_v23 = vpop.permute.xlu0 %434 }
 0x1d6   :  { %v592_v29 = vadd.f32 %v435_v23, %v1166_v48 }
 0x1d8   :  { %v624_v17 = vmax.f32 %v592_v29, 0.0 }
 0x1d9   :  { %v440_v25 = vpop.permute.xlu1 %439  ;;  %v520_v35 = vpop.permute.xlu0 %519 }
 0x1da   :  { %v593_v10 = vadd.f32 %v440_v25, %v401_v24  ;;  %v609_v58 = vadd.f32 %v520_v35, %v417_v41  ;;  %v720_v26 = vmul.f32 %v1241_v32, %v624_v17 }
 0x1dc   :  { %v625_v15 = vmax.f32 %v593_v10, 0.0  ;;  %v641_v18 = vmax.f32 %v609_v58, 0.0 }
 0x1dd   :  { %v515_v12 = vpop.permute.xlu1 %514  ;;  %v445_v31 = vpop.permute.xlu0 %444 }
 0x1de   :  { %v721_v48 = vmul.f32 %v1155_v39, %v625_v15  ;;  %v608_v40 = vadd.f32 %v515_v12, %v1169_v49  ;;  %v594_v1 = vadd.f32 %v445_v31, %v402_v34  ;;  %v737_v19 = vmul.f32 %v1155_v39, %v641_v18 }
 0x1df   :  { %v403_v49 = vmul.f32 %v1153_v37, %v1159_v44 }
 0x1e0   :  { %v752_v30 = vadd.f32 %v721_v48, %v720_v26  ;;  %v640_v13 = vmax.f32 %v608_v40, 0.0  ;;  %v626_v21 = vmax.f32 %v594_v1, 0.0 }
 0x1e1   :  { %v525_v50 = vpop.permute.xlu1 %524 }
 0x1e2   :  { %v736_v14 = vmul.f32 %v1241_v32, %v640_v13  ;;  %v722_v4 = vmul.f32 %v1163_v47, %v626_v21  ;;  %v610_v9 = vadd.f32 %v525_v50, %v418_v16  ;;  %v419_v32 = vmul.f32 %v1153_v37, %v1161_v45 }
 0x1e3   :  { %v405_v37 = vmul.f32 %v1157_v42, %v1159_v44  ;;  %v421_v50 = vmul.f32 %v1157_v42, %v1161_v45 }
 0x1e4   :  { %v773_v22 = vadd.f32 %v737_v19, %v736_v14  ;;  %v753_v7 = vadd.f32 %v752_v30, %v722_v4  ;;  %v642_v20 = vmax.f32 %v610_v9, 0.0  ;;  %v407_v14 = vmul.f32 %v1177_v53, %v1159_v44 }
 0x1e5   :  { %v450_v54 = vpop.permute.xlu1 %449  ;;  %v455_v11 = vpop.permute.xlu0 %454 }
 0x1e6   :  { %v738_v23 = vmul.f32 %v1163_v47, %v642_v20  ;;  %v595_v29 = vadd.f32 %v450_v54, %v403_v49  ;;  %v596_v33 = vadd.f32 %v455_v11, %v1172_v51  ;;  %v423_v11 = vmul.f32 %v1177_v53, %v1161_v45 }
 0x1e8   :  { %v774_v24 = vadd.f32 %v773_v22, %v738_v23  ;;  %v627_v39 = vmax.f32 %v595_v29, 0.0  ;;  %v628_v41 = vmax.f32 %v596_v33, 0.0 }
 0x1e9   :  { %v530_v17 = vpop.permute.xlu1 %529 }
 0x1ea   :  { %v723_v25 = vmul.f32 %v1243_v43, %v627_v39  ;;  %v611_v35 = vadd.f32 %v530_v17, %v419_v32  ;;  %v724_v58 = vmul.f32 %v1185_v57, %v628_v41 }
 0x1ec   :  { %v754_v10 = vadd.f32 %v753_v7, %v723_v25  ;;  %v643_v15 = vmax.f32 %v611_v35, 0.0 }
 0x1ed   :  { %v535_v34 = vpop.permute.xlu1 %534  ;;  %v545_v26 = vpop.permute.xlu0 %544 }
 0x1ee   :  { %v755_v47 = vadd.f32 %v754_v10, %v724_v58  ;;  %v739_v12 = vmul.f32 %v1243_v43, %v643_v15  ;;  %v612_v51 = vadd.f32 %v535_v34, %v1175_v52  ;;  %v614_v21 = vadd.f32 %v545_v26, %v1183_v56 }
 0x1f0   :  { %v775_v31 = vadd.f32 %v774_v24, %v739_v12  ;;  %v644_v48 = vmax.f32 %v612_v51, 0.0  ;;  %v646_v9 = vmax.f32 %v614_v21, 0.0 }
 0x1f1   :  { %v460_v18 = vpop.permute.xlu1 %459  ;;  %v470_v40 = vpop.permute.xlu0 %469 }
 0x1f2   :  { %v740_v1 = vmul.f32 %v1185_v57, %v644_v48  ;;  %v597_v30 = vadd.f32 %v460_v18, %v405_v37  ;;  %v599_v7 = vadd.f32 %v470_v40, %v407_v14  ;;  %v742_v23 = vmul.f32 %v1199_v0, %v646_v9 }
 0x1f4   :  { %v776_v13 = vadd.f32 %v775_v31, %v740_v1  ;;  %v629_v16 = vmax.f32 %v597_v30, 0.0  ;;  %v631_v29 = vmax.f32 %v599_v7, 0.0 }
 0x1f5   :  { %v540_v43 = vpop.permute.xlu1 %539  ;;  %v555_v19 = vpop.permute.xlu0 %554 }
 0x1f6   :  { %v725_v52 = vmul.f32 %v1245_v38, %v629_v16  ;;  %v613_v4 = vadd.f32 %v540_v43, %v421_v50  ;;  %v616_v42 = vadd.f32 %v555_v19, %v1191_v60 }
 0x1f8   :  { %v756_v22 = vadd.f32 %v755_v47, %v725_v52  ;;  %v645_v57 = vmax.f32 %v613_v4, 0.0  ;;  %v648_v25 = vmax.f32 %v616_v42, 0.0 }
 0x1f9   :  { %v465_v20 = vpop.permute.xlu1 %464  ;;  %v480_v49 = vpop.permute.xlu0 %479 }
 0x1fa   :  { %v741_v56 = vmul.f32 %v1245_v38, %v645_v57  ;;  %v598_v54 = vadd.f32 %v465_v20, %v1180_v55  ;;  %v727_v38 = vmul.f32 %v1247_v46, %v631_v29  ;;  %v601_v60 = vadd.f32 %v480_v49, %v1194_v62 }
 0x1fb   :  { %v744_v34 = vmul.f32 %v1213_v8, %v648_v25 }
 0x1fc   :  { %v777_v44 = vadd.f32 %v776_v13, %v741_v56  ;;  %v630_v33 = vmax.f32 %v598_v54, 0.0  ;;  %v633_v26 = vmax.f32 %v601_v60, 0.0  ;;  %v1417_v54 = vld [vmem:[#allocation10_spill] sm:$0xff] }
 0x1fd   :  { %v550_v24 = vpop.permute.xlu1 %549  ;;  %v565_v39 = vpop.permute.xlu0 %564 }
 0x1fe   :  { %v726_v41 = vmul.f32 %v1199_v0, %v630_v33  ;;  %v615_v32 = vadd.f32 %v550_v24, %v423_v11  ;;  %v778_v17 = vadd.f32 %v777_v44, %v742_v23  ;;  %v618_v47 = vadd.f32 %v565_v39, %v1205_v3  ;;  %v1418_v23 = vld [vmem:[#allocation17_spill] sm:$0xff]  ;;  %v1419_v24 = vld [vmem:[#allocation14_spill] sm:$0xff] }
 0x200   :  { %v757_v55 = vadd.f32 %v756_v22, %v726_v41  ;;  %v647_v35 = vmax.f32 %v615_v32, 0.0  ;;  %v1420_v32 = vld [vmem:[#allocation12_spill] sm:$0xff] }
 0x201   :  { %v475_v10 = vpop.permute.xlu1 %474  ;;  %v490_v45 = vpop.permute.xlu0 %489 }
 0x202   :  { %v743_v53 = vmul.f32 %v1247_v46, %v647_v35  ;;  %v600_v58 = vadd.f32 %v475_v10, %v1188_v59  ;;  %v758_v15 = vadd.f32 %v757_v55, %v727_v38  ;;  %v603_v18 = vadd.f32 %v490_v45, %v1208_v5  ;;  %v1421_v38 = vld [vmem:[#allocation18_spill] sm:$0xff] }
 0x203   :  { %v729_v46 = vmul.f32 %v1251_v61, %v633_v26  ;;  %v650_v59 = vmax.f32 %v618_v47, 0.0 }
 0x204   :  { %v779_v0 = vadd.f32 %v778_v17, %v743_v53  ;;  %v632_v12 = vmax.f32 %v600_v58, 0.0  ;;  %v635_v50 = vmax.f32 %v603_v18, 0.0  ;;  %v1422_v58 = vld [vmem:[#allocation13_spill] sm:$0xff] }
 0x205   :  { %v560_v51 = vpop.permute.xlu1 %559  ;;  %v575_v31 = vpop.permute.xlu0 %574 }
 0x206   :  { %v728_v48 = vmul.f32 %v1213_v8, %v632_v12  ;;  %v617_v62 = vadd.f32 %v560_v51, %v1197_v63  ;;  %v780_v37 = vadd.f32 %v779_v0, %v744_v34  ;;  %v746_v8 = vmul.f32 %v1227_v36, %v650_v59  ;;  %v1423_v12 = vld [vmem:[#allocation16_spill] sm:$0xff] }
 0x207   :  { %v620_v63 = vadd.f32 %v575_v31, %v1219_v27  ;;  %v731_v22 = vmul.f32 %v1255_v28, %v635_v50 }
 0x208   :  { %v759_v40 = vadd.f32 %v758_v15, %v728_v48  ;;  %v649_v1 = vmax.f32 %v617_v62, 0.0 }
 0x209   :  { %v485_v30 = vpop.permute.xlu1 %484  ;;  %v500_v13 = vpop.permute.xlu0 %499 }
 0x20a   :  { %v745_v21 = vmul.f32 %v1251_v61, %v649_v1  ;;  %v602_v3 = vadd.f32 %v485_v30, %v1202_v2  ;;  %v760_v16 = vadd.f32 %v759_v40, %v729_v46  ;;  %v652_v61 = vmax.f32 %v620_v63, 0.0  ;;  %v1416_v2 = vld [vmem:[#allocation11_spill] sm:$0xff] }
 0x20b   :  { %v605_v57 = vadd.f32 %v500_v13, %v1416_v2 }
 0x20c   :  { %v781_v43 = vadd.f32 %v780_v37, %v745_v21  ;;  %v634_v19 = vmax.f32 %v602_v3, 0.0  ;;  %v748_v29 = vmul.f32 %v1418_v23, %v652_v61  ;;  %v1424_v37 = vld [vmem:[#allocation15_spill] sm:$0xff]  ;;  %v795_v61 = vstv %s1396_s4  ;;  %s964_s4 = smov [#allocation5]  }
 0x20d   :  { %v570_v5 = vpop.permute.xlu1 %569  ;;  %v585_v52 = vpop.permute.xlu0 %584  ;;  %s841_s14 = sshll.u32 %s964_s4, 4  ;;  %s842_s14 = int_to_ptr.vmem [resolvable:$true] %s841_s14 }
 0x20e   :  { %v730_v14 = vmul.f32 %v1227_v36, %v634_v19  ;;  %v619_v4 = vadd.f32 %v570_v5, %v1211_v6  ;;  %v782_v9 = vadd.f32 %v781_v43, %v746_v8  ;;  %v637_v36 = vmax.f32 %v605_v57, 0.0  ;;  %s909_s17 = scalar_lea.vmem %s842_s14, 32  ;;  %p914_p1 = scmp.lt.s32.totalorder %s842_s14, %s842_s14 }
 0x20f   :  { %v622_v39 = vadd.f32 %v585_v52, %v1419_v24  ;;  %p910_p0 = scmp.ne.s32.totalorder %s842_s14, %s909_s17  ;;  %p915_p2 = scmp.lt.s32.totalorder %s909_s17, %s909_s17 }
 0x210   :  { %v761_v7 = vadd.f32 %v760_v16, %v730_v14  ;;  %v651_v20 = vmax.f32 %v619_v4, 0.0  ;;  %v733_v55 = vmul.f32 %v1421_v38, %v637_v36 }
 0x211   :  { %v495_v49 = vpop.permute.xlu1 %494  ;;  %v590_v11 = vpop.permute.xlu0 %589  ;;  %v654_v45 = vmax.f32 %v622_v39, 0.0  ;;  %p916_p3 = por %p915_p2, %p914_p1 }
 0x212   :  { %v747_v56 = vmul.f32 %v1255_v28, %v651_v20  ;;  %v604_v27 = vadd.f32 %v495_v49, %v1417_v54  ;;  %v762_v42 = vadd.f32 %v761_v7, %v731_v22  ;;  %v623_v51 = vadd.f32 %v590_v11, %v1423_v12 }
 0x213   :  { %p917_p4 = pnand %p916_p3, %p910_p0 }
 0x214   :  { %v783_v44 = vadd.f32 %v782_v9, %v747_v56  ;;  %v636_v6 = vmax.f32 %v604_v27, 0.0  ;;  %v655_v40 = vmax.f32 %v623_v51, 0.0  ;;  %v1425_v9 = vlaneseq }
 0x215   :  { %v580_v33 = vpop.permute.xlu1 %579 }
 0x216   :  { %v732_v41 = vmul.f32 %v1418_v23, %v636_v6  ;;  %v621_v17 = vadd.f32 %v580_v33, %v1420_v32  ;;  %v784_v25 = vadd.f32 %v783_v44, %v748_v29  ;;  %v714_v35 = vpop.permute.xlu0 %713  ;;  %v799_v22 = vand.u32 127, %v1425_v9 }
 0x217   :  { %v750_v0 = vmul.f32 %v714_v35, %v654_v45 }
 0x218   :  { %v763_v28 = vadd.f32 %v762_v42, %v732_v41  ;;  %v653_v60 = vmax.f32 %v621_v17, 0.0  ;;  %vm800_vm3 = vcmp.lt.s32.totalorder %v799_v22, 8  ;;  %v1426_v41 = vld [vmem:[#allocation9_spill] sm:$0xff] }
 0x219   :  { %v505_v10 = vpop.permute.xlu1 %504 }
 0x21a   :  { %v749_v53 = vmul.f32 %v1421_v38, %v653_v60  ;;  %v606_v15 = vadd.f32 %v505_v10, %v1422_v58  ;;  %v764_v34 = vadd.f32 %v763_v28, %v733_v55 }
 0x21c   :  { %v785_v26 = vadd.f32 %v784_v25, %v749_v53  ;;  %v638_v47 = vmax.f32 %v606_v15, 0.0 }
 0x21d   :  { %v510_v31 = vpop.permute.xlu1 %509 }
 0x21e   :  { %v786_v48 = vadd.f32 %v785_v26, %v750_v0  ;;  %v734_v62 = vmul.f32 %v714_v35, %v638_v47  ;;  %v607_v18 = vadd.f32 %v510_v31, %v1424_v37 }
 0x220   :  { %v765_v46 = vadd.f32 %v764_v34, %v734_v62  ;;  %v639_v59 = vmax.f32 %v607_v18, 0.0 }
 0x222   :  { %v718_v1 = vpop.permute.xlu1 %717 }
 0x223   :  { %v735_v30 = vmul.f32 %v718_v1, %v639_v59  ;;  %v751_v13 = vmul.f32 %v718_v1, %v655_v40 }
 0x225   :  { %v766_v21 = vadd.f32 %v765_v46, %v735_v30  ;;  %v787_v3 = vadd.f32 %v786_v48, %v751_v13 }
 0x227   :  { %v767_v16 = vrot.slane %v766_v21, 4  ;;  %v788_v50 = vrot.slane %v787_v3, 4 }
 0x229   :  { %v768_v8 = vadd.f32 %v767_v16, %v766_v21  ;;  %v789_v43 = vadd.f32 %v788_v50, %v787_v3 }
 0x22b   :  { %v769_v63 = vrot.slane %v768_v8, 2  ;;  %v790_v19 = vrot.slane %v789_v43, 2 }
 0x22d   :  { %v770_v5 = vadd.f32 %v769_v63, %v768_v8  ;;  %v791_v52 = vadd.f32 %v790_v19, %v789_v43 }
 0x22f   :  { %v771_v14 = vrot.slane %v770_v5, 1  ;;  %v792_v4 = vrot.slane %v791_v52, 1 }
 0x231   :  { %v772_v7 = vadd.f32 %v771_v14, %v770_v5  ;;  %v793_v2 = vadd.f32 %v792_v4, %v791_v52 }
 0x233   :  { %v796_v57 = vadd.f32 %v795_v61, %v772_v7  ;;  %v797_v20 = vadd.f32 %v795_v61, %v793_v2 }
 0x235   :  { %v804_v49 = vsel %vm803_vm2, %v797_v20, %v796_v57 }
 0x236   :  { %v806_v56 = vsel %vm800_vm3, %v804_v49, -1e+30 }
 0x237   :  { %v808_v54 = vsel %vm807_vm4, %v806_v56, -inf }
 0x238   :  { %809 = vmax.xlane.f32.xlu1 %v808_v54 }
 0x2c5   :  { %v810_v27 = vpop.xlane.xlu1 %809 }
 0x2c6   :  { %v811_v42 = vsub.f32 %v806_v56, %v810_v27 }
 0x2c8   :  { %v812_v11 = vmul.f32 1.442695, %v811_v42 }
 0x2ca   :  { %905 = vpow2.f32 %v812_v11 }
 0x2d4   :  { %v906_v23 = vpop.eup %905 }
 0x2d5   :  { %v814_v29 = vsel %vm807_vm4, %v906_v23, 0.0 }
 0x2d6   :  { %815 = vadd.xlane.f32.xlu0 %v814_v29 }
 0x363   :  { %v816_v36 = vpop.xlane.xlu0 %815 }
 0x364   :  { %907 = vrcp.f32 %v816_v36 }
 0x36e   :  { %v908_v44 = vpop.eup %907 }
 0x36f   :  { %v818_v6 = vmul.f32 %v908_v44, %v816_v36 }
 0x371   :  { %v819_v33 = vsub.f32 2.0, %v818_v6 }
 0x373   :  { %v820_v24 = vmul.f32 %v908_v44, %v819_v33 }
 0x375   :  { %v821_v39 = vmul.f32 %v906_v23, %v820_v24 }
 0x377   :  { %v823_v32 = vmul.f32 %v821_v39, %v1426_v41  ;;  %822 = vst [vmem:[#allocation5] sm:$0x3] %v821_v39 }
 0x378   :  { %920 = shalt.err (!%p917_p4)
}
 0x379   :  { %s921_s19 = scalar_lea.hbm %s1398_s6, 32 }
 0x37a   :  { %p922_p5 = scmp.ne.s32.totalorder %s1398_s6, %s921_s19  ;;  %p925_p6 = scmp.lt.u32.totalorder %s921_s19, %s1398_s6 }
 0x37c   :  { %p927_p7 = pnand %p925_p6, %p922_p5 }
 0x37e   :  { %930 = shalt.err (!%p927_p7)
}
 0x37f   :  { %844 = dma.vmem_to_hbm [thread:$0]  %s842_s14, 32, %s1398_s6, [#allocation6]   ;;  %824 = vst [vmem:[#allocation3] sm:$0x3] %v823_v32 }
 0x380   :  { %s931_s26 = scalar_lea.vmem %s832_s16, 32  ;;  %p936_p9 = scmp.lt.s32.totalorder %s832_s16, %s832_s16 }
 0x381   :  { %p932_p8 = scmp.ne.s32.totalorder %s832_s16, %s931_s26  ;;  %p937_p10 = scmp.lt.s32.totalorder %s931_s26, %s931_s26 }
 0x383   :  { %p938_p11 = por %p937_p10, %p936_p9 }
 0x385   :  { %p939_p12 = pnand %p938_p11, %p932_p8 }
 0x387   :  { %942 = shalt.err (!%p939_p12)
}
 0x388   :  { %s943_s29 = scalar_lea.hbm %s1397_s5, 32 }
 0x389   :  { %p944_p13 = scmp.ne.s32.totalorder %s1397_s5, %s943_s29  ;;  %p947_p0 = scmp.lt.u32.totalorder %s943_s29, %s1397_s5 }
 0x38b   :  { %p949_p1 = pnand %p947_p0, %p944_p13 }
 0x38d   :  { %952 = shalt.err (!%p949_p1)
}
 0x38e   :  { %834 = dma.vmem_to_hbm [thread:$0]  %s832_s16, 32, %s1397_s5, [#allocation4]  }
 0x38f   :  { %953 = dma.done.wait [#allocation4], 32  }
 0x390   :  { %954 = vsyncadd [#allocation4], 4294967264 }
 0x391   :  { %955 = dma.done.wait [#allocation6], 32  }
 0x392   :  { %956 = vsyncadd [#allocation6], 4294967264 }
 0x393   :  { %851 = vsyncpa [#allocation4], 1 }
 0x394   :  { %852 = vsyncpa [#allocation6], 1 }

</bundles_post_ra>
